<compile_context>
chip_gen: v7x
topology: tpu7x:2x2x1
jax: 0.10.0
libtpu: 0.0.40
codegen_flags: <defaults>
</compile_context>

<pallas_src>
import jax
import jax.numpy as jnp
from jax.experimental import pallas as pl
from jax.experimental.pallas import tpu as pltpu


# ---------------------------------------------------------------------------
# Fused kernel (feature-major: every tensor is [features, batch_tile])
# ---------------------------------------------------------------------------

def _make_fused_policy_kernel(num_layers):
    """Kernel refs: slopes (SMEM), x^T, w0, b0, ..., w{L-1}, b{L-1}, out^T."""

    def kernel(slopes_ref, xt_ref, *refs):
        out_ref = refs[-1]
        wb = refs[:-1]

        h = xt_ref[...]                                   # [in_dim, tb] f32

        # Hidden layers: y^T = W @ h^T + b ; PReLU in f32.
        for i in range(num_layers - 1):
            w = wb[2 * i][...].astype(jnp.bfloat16)       # [out, in]  (PyTorch layout)
            b = wb[2 * i + 1][...]                        # [out, 1]   f32, lane-broadcast
            y = jnp.dot(w, h.astype(jnp.bfloat16),
                        preferred_element_type=jnp.float32) + b
            a = slopes_ref[i]                             # scalar PReLU slope (SMEM)
            h = jnp.where(y >= 0.0, y, a * y)

        # Output layer + stabilized softmax over the feature (sublane) axis.
        w = wb[2 * (num_layers - 1)][...].astype(jnp.bfloat16)
        b = wb[2 * (num_layers - 1) + 1][...]
        y = jnp.dot(w, h.astype(jnp.bfloat16),
                    preferred_element_type=jnp.float32) + b        # [out_dim, tb]
        m = jnp.max(y, axis=0, keepdims=True)                      # [1, tb]
        e = jnp.exp(y - m)
        denom = jnp.sum(e, axis=0, keepdims=True)
        out_ref[...] = e * pl.reciprocal(denom, approx=True)

    return kernel


# ---------------------------------------------------------------------------
# Wrapper
# ---------------------------------------------------------------------------

def _choose_batch_tile(batch, target):
    """Lane-axis batch tile: multiple of 128, >=2 grid steps when batch allows."""
    b128 = -(-batch // 128) * 128                # batch rounded up to lane multiple
    tb = min(max(target, 128), b128)
    tb = (tb // 128) * 128
    # v7x megacore: keep at least 2 grid steps so the "parallel" axis can shard
    # across both TensorCores (no-op on single-TC v5e/v6e).
    if b128 >= 256 and tb > b128 // 2:
        tb = max(128, ((b128 // 2) // 128) * 128)
    grid_n = -(-b128 // tb)
    return tb, grid_n, grid_n * tb


def policy_discrete_forward(x, params, slopes, *, batch_tile=512):
    """x: [B, in]; params: list of (w [out, in], b [out, 1]); slopes: [L-1] PReLU slopes."""
    B, in_dim = x.shape
    out_dim = params[-1][0].shape[0]
    num_layers = len(params)

    tb, grid_n, b_pad = _choose_batch_tile(B, batch_tile)

    # Feature-major input: [in_dim, B] padded on the batch (lane) axis.
    xt = x.T
    if b_pad != B:
        xt = jnp.pad(xt, ((0, 0), (0, b_pad - B)))

    # Guard the single-Linear edge case (zero-sized SMEM operand).
    slopes_arg = slopes if slopes.size > 0 else jnp.zeros((1,), jnp.float32)

    in_specs = [
        pl.BlockSpec(memory_space=pltpu.MemorySpace.SMEM),    # PReLU slopes (whole array)
        pl.BlockSpec((in_dim, tb), lambda i: (0, i)),         # x^T: streamed over batch
    ]
    flat_args = [slopes_arg, xt]
    for (w, b) in params:
        dout, din = w.shape
        # Same block at every grid step -> weights/biases stay VMEM-resident.
        in_specs.append(pl.BlockSpec((dout, din), lambda i: (0, 0)))
        in_specs.append(pl.BlockSpec((dout, 1), lambda i: (0, 0)))
        flat_args += [w, b]

    flops = 2 * b_pad * sum(int(w.shape[0]) * int(w.shape[1]) for w, _ in params)
    transcendentals = b_pad * (out_dim + 1)                   # exp + approx reciprocal
    bytes_accessed = (b_pad * (in_dim + out_dim)) * 4 \
        + sum(int(w.size) * 4 + int(b.size) * 4 for w, b in params)

    out_t = pl.pallas_call(
        _make_fused_policy_kernel(num_layers),
        out_shape=jax.ShapeDtypeStruct((out_dim, b_pad), jnp.float32),
        grid_spec=pltpu.PrefetchScalarGridSpec(
            num_scalar_prefetch=0,
            grid=(grid_n,),
            in_specs=in_specs,
            out_specs=pl.BlockSpec((out_dim, tb), lambda i: (0, i)),
        ),
        compiler_params=pltpu.CompilerParams(
            # Independent batch tiles -> shard across the 2 TCs on v7x megacore.
            dimension_semantics=("parallel",),
        ),
        cost_estimate=pl.CostEstimate(
            flops=flops,
            transcendentals=transcendentals,
            bytes_accessed=bytes_accessed,
        ),
    )(*flat_args)

    # Back to the PyTorch [B, out_dim] convention; drop batch padding.
    return out_t[:, :B].T


# ---------------------------------------------------------------------------
# Parameter init + pure-JAX reference (for correctness check)
# ---------------------------------------------------------------------------

def init_policy_params(key, layers_size):
    """Torch defaults: Linear U(-1/sqrt(fan_in), 1/sqrt(fan_in)); PReLU slope 0.25.
    Weights kept in PyTorch-native [out, in] layout; biases as [out, 1]."""
    params = []
    for fan_in, fan_out in zip(layers_size[:-1], layers_size[1:]):
        key, kw, kb = jax.random.split(key, 3)
        bound = 1.0 / (fan_in ** 0.5)
        w = jax.random.uniform(kw, (fan_out, fan_in), jnp.float32, -bound, bound)
        b = jax.random.uniform(kb, (fan_out, 1), jnp.float32, -bound, bound)
        params.append((w, b))
    # forward() only uses the first L-1 PReLU activations.
    n_act = max(len(params) - 1, 1)
    slopes = jnp.full((n_act,), 0.25, dtype=jnp.float32)
    return params, slopes


def policy_discrete_reference(x, params, slopes):
    h = x
    for i, (w, b) in enumerate(params[:-1]):
        y = h @ w.T + b[:, 0]
        h = jnp.where(y >= 0.0, y, slopes[i] * y)
    w, b = params[-1]
    return jax.nn.softmax(h @ w.T + b[:, 0], axis=-1)


# ---------------------------------------------------------------------------
# Demo / smoke test
# ---------------------------------------------------------------------------

if __name__ == "__main__":
    layers_size = [32, 64, 64, 8]   # 32 input features -> 8 discrete actions

    key = jax.random.PRNGKey(0)
    key, kp = jax.random.split(key)
    params, slopes = init_policy_params(kp, layers_size)

    # batch=6: exercises batch padding (not lane/sublane aligned);
    # batch=256: exercises the streaming batch grid (2 tiles -> both TCs on v7x).
    for batch in (6, 256):
        key, kx = jax.random.split(key)
        x = jax.random.normal(kx, (batch, layers_size[0]), jnp.float32)

        probs = jax.block_until_ready(policy_discrete_forward(x, params, slopes))
        ref = policy_discrete_reference(x, params, slopes)

        assert probs.shape == (batch, layers_size[-1])
        # approx=True reciprocal -> row sums within ~1e-3 of 1.0
        assert bool(jnp.all(jnp.abs(jnp.sum(probs, axis=-1) - 1.0) < 5e-3))
        # bf16 MXU operands (f32 accumulation) + approx reciprocal -> small drift vs f32 ref
        assert bool(jnp.all(jnp.abs(probs - ref) < 3e-2))
        assert bool(jnp.all(probs >= 0.0))

    # TODO(synk): update()/sample_action()/predict() (RMSprop training + numpy
    # sampling) are host-side training utilities, not part of the forward pass.
    print("KERNEL_OK")
</pallas_src>

<mosaic_0001>
module attributes {stable_mosaic.version = 11 : i64} {
  func.func @kernel(%arg0: i32, %arg1: memref<2xf32, #tpu.memory_space<smem>>, %arg2: memref<32x128xf32, #tpu.memory_space<vmem>>, %arg3: memref<64x32xf32, #tpu.memory_space<vmem>>, %arg4: memref<64x1xf32, #tpu.memory_space<vmem>>, %arg5: memref<64x64xf32, #tpu.memory_space<vmem>>, %arg6: memref<64x1xf32, #tpu.memory_space<vmem>>, %arg7: memref<8x64xf32, #tpu.memory_space<vmem>>, %arg8: memref<8x1xf32, #tpu.memory_space<vmem>>, %arg9: memref<8x128xf32, #tpu.memory_space<vmem>>) attributes {dimension_semantics = [#tpu.dimension_semantics<parallel>], iteration_bounds = array<i64: 1>, scalar_prefetch = 0 : i64, scratch_operands = 0 : i64, tpu.core_type = #tpu.core_type<tc>, window_params = [{transform_indices = @transform_0, window_bounds = array<i64: 2>}, {transform_indices = @transform_1, window_bounds = array<i64: 32, 128>}, {pipeline_mode = #tpu.pipeline_mode<synchronous>, transform_indices = @transform_2, window_bounds = array<i64: 64, 32>}, {pipeline_mode = #tpu.pipeline_mode<synchronous>, transform_indices = @transform_3, window_bounds = array<i64: 64, 1>}, {pipeline_mode = #tpu.pipeline_mode<synchronous>, transform_indices = @transform_4, window_bounds = array<i64: 64, 64>}, {pipeline_mode = #tpu.pipeline_mode<synchronous>, transform_indices = @transform_5, window_bounds = array<i64: 64, 1>}, {pipeline_mode = #tpu.pipeline_mode<synchronous>, transform_indices = @transform_6, window_bounds = array<i64: 8, 64>}, {pipeline_mode = #tpu.pipeline_mode<synchronous>, transform_indices = @transform_7, window_bounds = array<i64: 8, 1>}, {transform_indices = @transform_8, window_bounds = array<i64: 8, 128>}]} {
    %c0 = arith.constant 0 : index
    %c0_0 = arith.constant 0 : index
    %0 = vector.load %arg2[%c0, %c0_0] : memref<32x128xf32, #tpu.memory_space<vmem>>, vector<32x128xf32>
    %c0_1 = arith.constant 0 : index
    %c0_2 = arith.constant 0 : index
    %1 = vector.load %arg3[%c0_1, %c0_2] : memref<64x32xf32, #tpu.memory_space<vmem>>, vector<64x32xf32>
    %2 = arith.truncf %1 : vector<64x32xf32> to vector<64x32xbf16>
    %c0_3 = arith.constant 0 : index
    %c0_4 = arith.constant 0 : index
    %3 = vector.load %arg4[%c0_3, %c0_4] : memref<64x1xf32, #tpu.memory_space<vmem>>, vector<64x1xf32>
    %4 = arith.truncf %0 : vector<32x128xf32> to vector<32x128xbf16>
    %cst = arith.constant dense<0.000000e+00> : vector<64x128xf32>
    %5 = tpu.matmul %2, %4, %cst {dimension_numbers = #tpu.dot_dimension_numbers<[1], [0], [0], [1], [0, 0, 1, 1], [], []>} : vector<64x32xbf16>, vector<32x128xbf16>, vector<64x128xf32> -> vector<64x128xf32>
    %6 = vector.broadcast %3 : vector<64x1xf32> to vector<64x128xf32>
    %7 = arith.addf %5, %6 : vector<64x128xf32>
    %c0_5 = arith.constant 0 : index
    %8 = memref.load %arg1[%c0_5] : memref<2xf32, #tpu.memory_space<smem>>
    %cst_6 = arith.constant 0.000000e+00 : f32
    %9 = vector.broadcast %cst_6 : f32 to vector<64x128xf32>
    %10 = arith.cmpf oge, %7, %9 : vector<64x128xf32>
    %11 = vector.broadcast %8 : f32 to vector<64x128xf32>
    %12 = arith.mulf %11, %7 : vector<64x128xf32>
    %13 = arith.select %10, %7, %12 : vector<64x128xi1>, vector<64x128xf32>
    %c0_7 = arith.constant 0 : index
    %c0_8 = arith.constant 0 : index
    %14 = vector.load %arg5[%c0_7, %c0_8] : memref<64x64xf32, #tpu.memory_space<vmem>>, vector<64x64xf32>
    %15 = arith.truncf %14 : vector<64x64xf32> to vector<64x64xbf16>
    %c0_9 = arith.constant 0 : index
    %c0_10 = arith.constant 0 : index
    %16 = vector.load %arg6[%c0_9, %c0_10] : memref<64x1xf32, #tpu.memory_space<vmem>>, vector<64x1xf32>
    %17 = arith.truncf %13 : vector<64x128xf32> to vector<64x128xbf16>
    %cst_11 = arith.constant dense<0.000000e+00> : vector<64x128xf32>
    %18 = tpu.matmul %15, %17, %cst_11 {dimension_numbers = #tpu.dot_dimension_numbers<[1], [0], [0], [1], [0, 0, 1, 1], [], []>} : vector<64x64xbf16>, vector<64x128xbf16>, vector<64x128xf32> -> vector<64x128xf32>
    %19 = vector.broadcast %16 : vector<64x1xf32> to vector<64x128xf32>
    %20 = arith.addf %18, %19 : vector<64x128xf32>
    %c1 = arith.constant 1 : index
    %21 = memref.load %arg1[%c1] : memref<2xf32, #tpu.memory_space<smem>>
    %cst_12 = arith.constant 0.000000e+00 : f32
    %22 = vector.broadcast %cst_12 : f32 to vector<64x128xf32>
    %23 = arith.cmpf oge, %20, %22 : vector<64x128xf32>
    %24 = vector.broadcast %21 : f32 to vector<64x128xf32>
    %25 = arith.mulf %24, %20 : vector<64x128xf32>
    %26 = arith.select %23, %20, %25 : vector<64x128xi1>, vector<64x128xf32>
    %c0_13 = arith.constant 0 : index
    %c0_14 = arith.constant 0 : index
    %27 = vector.load %arg7[%c0_13, %c0_14] : memref<8x64xf32, #tpu.memory_space<vmem>>, vector<8x64xf32>
    %28 = arith.truncf %27 : vector<8x64xf32> to vector<8x64xbf16>
    %c0_15 = arith.constant 0 : index
    %c0_16 = arith.constant 0 : index
    %29 = vector.load %arg8[%c0_15, %c0_16] : memref<8x1xf32, #tpu.memory_space<vmem>>, vector<8x1xf32>
    %30 = arith.truncf %26 : vector<64x128xf32> to vector<64x128xbf16>
    %cst_17 = arith.constant dense<0.000000e+00> : vector<8x128xf32>
    %31 = tpu.matmul %28, %30, %cst_17 {dimension_numbers = #tpu.dot_dimension_numbers<[1], [0], [0], [1], [0, 0, 1, 1], [], []>} : vector<8x64xbf16>, vector<64x128xbf16>, vector<8x128xf32> -> vector<8x128xf32>
    %32 = vector.broadcast %29 : vector<8x1xf32> to vector<8x128xf32>
    %33 = arith.addf %31, %32 : vector<8x128xf32>
    %cst_18 = arith.constant dense<0xFF800000> : vector<128xf32>
    %34 = vector.multi_reduction <maximumf>, %33, %cst_18 [0] : vector<8x128xf32> to vector<128xf32>
    %35 = vector.shape_cast %34 : vector<128xf32> to vector<1x128xf32>
    %36 = vector.broadcast %35 : vector<1x128xf32> to vector<8x128xf32>
    %37 = arith.subf %33, %36 : vector<8x128xf32>
    %38 = math.exp %37 : vector<8x128xf32>
    %cst_19 = arith.constant dense<0.000000e+00> : vector<128xf32>
    %39 = vector.multi_reduction <add>, %38, %cst_19 [0] : vector<8x128xf32> to vector<128xf32>
    %40 = vector.shape_cast %39 : vector<128xf32> to vector<1x128xf32>
    %41 = tpu.reciprocal %40 {approx = true} : vector<1x128xf32> -> vector<1x128xf32>
    %42 = vector.broadcast %41 : vector<1x128xf32> to vector<8x128xf32>
    %43 = arith.mulf %38, %42 : vector<8x128xf32>
    %c0_20 = arith.constant 0 : index
    %c0_21 = arith.constant 0 : index
    %44 = vector.load %arg9[%c0_20, %c0_21] : memref<8x128xf32, #tpu.memory_space<vmem>>, vector<8x128xf32>
    tpu.vector_store %arg9[%c0_20, %c0_21], %43 {strides = array<i32>} : memref<8x128xf32, #tpu.memory_space<vmem>>, vector<8x128xf32>,
    return
  }
  func.func @transform_0(%arg0: i32) -> i32 {
    %c0_i32 = arith.constant 0 : i32
    %c0_i32_0 = arith.constant 0 : i32
    return %c0_i32 : i32
  }
  func.func @transform_1(%arg0: i32) -> (i32, i32) {
    %c0_i32 = arith.constant 0 : i32
    %c0_i32_0 = arith.constant 0 : i32
    return %c0_i32, %arg0 : i32, i32
  }
  func.func @transform_2(%arg0: i32) -> (i32, i32) {
    %c0_i32 = arith.constant 0 : i32
    %c0_i32_0 = arith.constant 0 : i32
    %c0_i32_1 = arith.constant 0 : i32
    return %c0_i32, %c0_i32_0 : i32, i32
  }
  func.func @transform_3(%arg0: i32) -> (i32, i32) {
    %c0_i32 = arith.constant 0 : i32
    %c0_i32_0 = arith.constant 0 : i32
    %c0_i32_1 = arith.constant 0 : i32
    return %c0_i32, %c0_i32_0 : i32, i32
  }
  func.func @transform_4(%arg0: i32) -> (i32, i32) {
    %c0_i32 = arith.constant 0 : i32
    %c0_i32_0 = arith.constant 0 : i32
    %c0_i32_1 = arith.constant 0 : i32
    return %c0_i32, %c0_i32_0 : i32, i32
  }
  func.func @transform_5(%arg0: i32) -> (i32, i32) {
    %c0_i32 = arith.constant 0 : i32
    %c0_i32_0 = arith.constant 0 : i32
    %c0_i32_1 = arith.constant 0 : i32
    return %c0_i32, %c0_i32_0 : i32, i32
  }
  func.func @transform_6(%arg0: i32) -> (i32, i32) {
    %c0_i32 = arith.constant 0 : i32
    %c0_i32_0 = arith.constant 0 : i32
    %c0_i32_1 = arith.constant 0 : i32
    return %c0_i32, %c0_i32_0 : i32, i32
  }
  func.func @transform_7(%arg0: i32) -> (i32, i32) {
    %c0_i32 = arith.constant 0 : i32
    %c0_i32_0 = arith.constant 0 : i32
    %c0_i32_1 = arith.constant 0 : i32
    return %c0_i32, %c0_i32_0 : i32, i32
  }
  func.func @transform_8(%arg0: i32) -> (i32, i32) {
    %c0_i32 = arith.constant 0 : i32
    %c0_i32_0 = arith.constant 0 : i32
    return %c0_i32, %arg0 : i32, i32
  }
}

</mosaic_0001>

<bundles_post_ra>
// kernel: tpu_custom_call.1
= control target key start
LH: loop header
LB: loop body
LE: loop exit
PB: predicated region body
PF: predicated region fallthrough
CT: control target
= control target key end

     0   :  { %13 = vsyncpa [#allocation4], 0  ;;  %s781_s0 = inlined_call_operand.vmem [shape: f32[2], index: 0, kind: input, shape index: {}]   ;;  %s782_s1 = inlined_call_operand.vmem [shape: f32[32,128], index: 1, kind: input, shape index: {}]   ;;  %s783_s2 = inlined_call_operand.vmem [shape: f32[64,32], index: 2, kind: input, shape index: {}]   ;;  %s784_s3 = inlined_call_operand.vmem [shape: f32[64,1], index: 3, kind: input, shape index: {}]   ;;  %s785_s4 = inlined_call_operand.vmem [shape: f32[64,64], index: 4, kind: input, shape index: {}]   ;;  %s786_s5 = inlined_call_operand.vmem [shape: f32[64,1], index: 5, kind: input, shape index: {}]   ;;  %s787_s6 = inlined_call_operand.vmem [shape: f32[8,64], index: 6, kind: input, shape index: {}]   ;;  %s788_s7 = inlined_call_operand.vmem [shape: f32[8,1], index: 7, kind: input, shape index: {}]   ;;  %s789_s8 = inlined_call_operand.hbm [shape: f32[8,128], index: 8, kind: output, shape index: {}]  }
   0x1   :  { %14 = vsyncpa [#allocation3], 0  ;;  %s21_s29 = sshll.u32 %s781_s0, 4  ;;  %s22_s29 = int_to_ptr.vmem [resolvable:$true] %s21_s29 }
   0x2   :  { %s550_s30 = scalar_lea.vmem %s22_s29, 16  ;;  %p555_p1 = scmp.lt.s32.totalorder %s22_s29, %s22_s29 }
   0x3   :  { %p551_p0 = scmp.ne.s32.totalorder %s22_s29, %s550_s30  ;;  %p556_p2 = scmp.lt.s32.totalorder %s550_s30, %s550_s30 }
   0x5   :  { %p557_p3 = por %p556_p2, %p555_p1 }
   0x7   :  { %p558_p4 = pnand %p557_p3, %p551_p0 }
   0x9   :  { %561 = shalt.err (!%p558_p4)
}
   0xa   :  { %s588_s9 = smov [#allocation2]  }
   0xb   :  { %24 = dma.vmem_to_smem %s22_s29, 16, %s588_s9, [#allocation4]  }
   0xc   :  { %584 = dma.done.wait [#allocation4], 16  }
   0xd   :  { %585 = vsyncadd [#allocation4], 4294967280 }
   0xe   :  { %42 = sfence }
   0xf   :  { %v44_v0 = vld [vmem:[%s782_s1] sm:$0xff]  ;;  %v45_v1 = vld [vmem:[%s782_s1 + $0x8] sm:$0xff]  ;;  %v46_v2 = vld [vmem:[%s782_s1 + $0x10] sm:$0xff]  ;;  %vm110_vm0 = vcmask 261120   ;;  %v589_v7 = vmov 0   ;;  %vm278_vm1 = vcmask 523264  }
  0x10   :  { %v68_v3 = vpack.c.bf16 %v45_v1, %v44_v0  ;;  %v47_v4 = vld [vmem:[%s782_s1 + $0x18] sm:$0xff]  ;;  %v48_v5 = vld [vmem:[%s783_s2] sm:$0xff]  ;;  %v49_v6 = vld [vmem:[%s783_s2 + $0x8] sm:$0xff]  ;;  %544 = vset.pattern.permute.xlu0 %v589_v7  ;;  %545 = vset.pattern.permute.xlu1 %v589_v7  ;;  %vm591_vm10 = vmmov 0  }
  0x11   :  { %v69_v8 = vpack.c.bf16 %v47_v4, %v46_v2  ;;  %v56_v9 = vpack.c.bf16 %v49_v6, %v48_v5  ;;  %v50_v10 = vld [vmem:[%s783_s2 + $0x10] sm:$0xff]  ;;  %v51_v11 = vld [vmem:[%s783_s2 + $0x18] sm:$0xff]  ;;  %v60_v12 = vld [vmem:[%s784_s3] sm:$0xff] }
  0x12   :  { %499 = vmatprep.subr.bf16.mxu0 %v68_v3  ;;  %v62_v13 = vld [vmem:[%s784_s3 + $0x10] sm:$0xff]  ;;  %v52_v14 = vld [vmem:[%s783_s2 + $0x20] sm:$0xff]  ;;  %v53_v15 = vld [vmem:[%s783_s2 + $0x28] sm:$0xff]  ;;  %72 = vperm.xlu0 %544, %v60_v12   ;;  %v57_v17 = vpack.c.bf16 %v51_v11, %v50_v10 }
  0x13   :  { %500 = vmatpush3.bf16.msra.mxu0 %v68_v3  ;;  %503 = vmatprep.mubr.msk.bf16.mxu0 %vm110_vm0, %v56_v9  ;;  %v61_v16 = vld [vmem:[%s784_s3 + $0x8] sm:$0xff]  ;;  %v63_v18 = vld [vmem:[%s784_s3 + $0x18] sm:$0xff]  ;;  %v58_v19 = vpack.c.bf16 %v53_v15, %v52_v14  ;;  %v64_v20 = vld [vmem:[%s784_s3 + $0x20] sm:$0xff] }
  0x14   :  { %501 = vmatprep.subr.bf16.mxu0 %v69_v8  ;;  %82 = vperm.xlu1 %545, %v62_v13   ;;  %v65_v21 = vld [vmem:[%s784_s3 + $0x28] sm:$0xff]  ;;  %v54_v22 = vld [vmem:[%s783_s2 + $0x30] sm:$0xff]  ;;  %v55_v23 = vld [vmem:[%s783_s2 + $0x38] sm:$0xff] }
  0x15   :  { %v66_v24 = vld [vmem:[%s784_s3 + $0x30] sm:$0xff]  ;;  %v59_v25 = vpack.c.bf16 %v55_v23, %v54_v22  ;;  %v67_v26 = vld [vmem:[%s784_s3 + $0x38] sm:$0xff]  ;;  %v226_v27 = vld [vmem:[%s786_s5] sm:$0xff]  ;;  %s478_s3 = sld [smem:[#allocation2 + $0x1]] }
  0x16   :  { %77 = vperm.xlu0 %544, %v61_v16   ;;  %v227_v28 = vld [vmem:[%s786_s5 + $0x8] sm:$0xff]  ;;  %v228_v29 = vld [vmem:[%s786_s5 + $0x10] sm:$0xff]  ;;  %v229_v30 = vld [vmem:[%s786_s5 + $0x18] sm:$0xff] }
  0x17   :  { %502 = vmatpush3.bf16.msra.mxu0 %v69_v8  ;;  %v230_v31 = vld [vmem:[%s786_s5 + $0x20] sm:$0xff]  ;;  %v231_v32 = vld [vmem:[%s786_s5 + $0x28] sm:$0xff]  ;;  %v232_v33 = vld [vmem:[%s786_s5 + $0x30] sm:$0xff] }
  0x18   :  { %87 = vperm.xlu1 %545, %v63_v18   ;;  %v233_v34 = vld [vmem:[%s786_s5 + $0x38] sm:$0xff]  ;;  %v384_v35 = vld [vmem:[%s788_s7] sm:$0xff]  ;;  %v215_v37 = vld [vmem:[%s785_s4 + $0x8] sm:$0xff]  ;;  %s188_s5 = sld [smem:[#allocation2]] }
  0x19   :  { %v214_v36 = vld [vmem:[%s785_s4] sm:$0xff]  ;;  %v219_v23 = vld [vmem:[%s785_s4 + $0x28] sm:$0xff] }
  0x1a   :  { %504 = vmatmul.mubr.msk.bf16.vlgmr.msra.gmra.mrb[0].mxu0 %vm110_vm0, %v57_v17  ;;  %92 = vperm.xlu0 %544, %v64_v20   ;;  %v222_v38 = vpack.c.bf16 %v215_v37, %v214_v36  ;;  %v216_v20 = vld [vmem:[%s785_s4 + $0x10] sm:$0xff]  ;;  %v218_v22 = vld [vmem:[%s785_s4 + $0x20] sm:$0xff] }
  0x1b   :  { %507 = vmatprep.mubr.msk.bf16.mxu0 %vm110_vm0, %v58_v19 }
  0x1c   :  { %97 = vperm.xlu1 %545, %v65_v21   ;;  %519 = vmatprep.mubr.msk.bf16.mxu1 %vm278_vm1, %v222_v38  ;;  %v217_v21 = vld [vmem:[%s785_s4 + $0x18] sm:$0xff] }
  0x1e   :  { %102 = vperm.xlu0 %544, %v66_v24   ;;  %v197_v44 = vstv %s188_s5  ;;  %v223_v24 = vpack.c.bf16 %v217_v21, %v216_v20 }
  0x20   :  { %107 = vperm.xlu1 %545, %v67_v26   ;;  %v220_v26 = vld [vmem:[%s785_s4 + $0x30] sm:$0xff] }
  0x22   :  { %508 = vmatmul.mubr.msk.bf16.gmra.mrb[4].mxu0 %vm110_vm0, %v59_v25  ;;  %240 = vperm.xlu0 %544, %v226_v27   ;;  %v224_v25 = vpack.c.bf16 %v219_v23, %v218_v22  ;;  %v221_v27 = vld [vmem:[%s785_s4 + $0x38] sm:$0xff] }
  0x24   :  { %245 = vperm.xlu1 %545, %v227_v28   ;;  %v225_v28 = vpack.c.bf16 %v221_v27, %v220_v26 }
  0x26   :  { %250 = vperm.xlu0 %544, %v228_v29   ;;  %v590_v29 = vmov 0.0  }
  0x27   :  { %527 = vmatprep.subr.bf16.mxu0 %v590_v29  ;;  %535 = vmatprep.mubr.msk.bf16.mxu0 %vm591_vm10, %v590_v29 }
  0x28   :  { %255 = vperm.xlu1 %545, %v229_v30  }
  0x2a   :  { %260 = vperm.xlu0 %544, %v230_v31  }
  0x2c   :  { %265 = vperm.xlu1 %545, %v231_v32  }
  0x2e   :  { %270 = vperm.xlu0 %544, %v232_v33  }
  0x30   :  { %275 = vperm.xlu1 %545, %v233_v34  }
  0x32   :  { %391 = vperm.xlu0 %544, %v384_v35   ;;  %v365_v35 = vstv %s478_s3 }
  0x91   :  { %v73_v39 = vpop.permute.xlu0 %72 }
  0x93   :  { %v83_v40 = vpop.permute.xlu1 %82 }
  0x95   :  { %v78_v41 = vpop.permute.xlu0 %77 }
  0x97   :  { %v88_v42 = vpop.permute.xlu1 %87 }
  0x99   :  { %v93_v47 = vpop.permute.xlu0 %92 }
  0x9b   :  { %v98_v53 = vpop.permute.xlu1 %97 }
  0x9d   :  { %v103_v60 = vpop.permute.xlu0 %102 }
  0x9f   :  { %v108_v4 = vpop.permute.xlu1 %107 }
  0xa1   :  { %v241_v30 = vpop.permute.xlu0 %240 }
  0xa3   :  { %v246_v31 = vpop.permute.xlu1 %245 }
  0xa5   :  { %v251_v32 = vpop.permute.xlu0 %250 }
  0xa7   :  { %v256_v33 = vpop.permute.xlu1 %255 }
  0xa9   :  { %v261_v38 = vpop.permute.xlu0 %260 }
  0xed   :  { %v505_v43 = vpop.f32.mrb[0].mxu0 }
  0xee   :  { %v166_v45 = vadd.f32 %v505_v43, %v83_v40  ;;  %v157_v46 = vpop.f32.mrb[1].mxu0 }
  0xef   :  { %v158_v48 = vadd.f32 %v157_v46, %v73_v39  ;;  %v506_v49 = vpop.f32.mrb[2].mxu0 }
  0xf0   :  { %v200_v50 = vmul.f32 %v197_v44, %v166_v45  ;;  %v169_v51 = vadd.f32 %v506_v49, %v88_v42  ;;  %v160_v52 = vpop.f32.mrb[3].mxu0  ;;  %vm191_vm2 = vcmp.ge.f32.partialorder %v166_v45, 0.0 }
  0xf1   :  { %v198_v54 = vmul.f32 %v197_v44, %v158_v48  ;;  %v161_v55 = vadd.f32 %v160_v52, %v78_v41  ;;  %vm189_vm4 = vcmp.ge.f32.partialorder %v158_v48, 0.0 }
  0xf2   :  { %vm192_vm3 = vcmp.ge.f32.partialorder %v169_v51, 0.0  ;;  %v201_v56 = vmul.f32 %v197_v44, %v169_v51  ;;  %v208_v58 = vsel %vm191_vm2, %v166_v45, %v200_v50 }
  0xf3   :  { %v199_v57 = vmul.f32 %v197_v44, %v161_v55  ;;  %vm190_vm5 = vcmp.ge.f32.partialorder %v161_v55, 0.0  ;;  %v206_v62 = vsel %vm189_vm4, %v158_v48, %v198_v54 }
  0xf4   :  { %v209_v59 = vsel %vm192_vm3, %v169_v51, %v201_v56  ;;  %v271_v51 = vpop.permute.xlu0 %270 }
  0xf5   :  { %v509_v61 = vpop.f32.mrb[4].mxu0  ;;  %v207_v63 = vsel %vm190_vm5, %v161_v55, %v199_v57  ;;  %v235_v0 = vpack.c.bf16 %v209_v59, %v208_v58 }
  0xf6   :  { %v182_v1 = vadd.f32 %v509_v61, %v103_v60  ;;  %v173_v2 = vpop.f32.mrb[5].mxu0  ;;  %v234_v3 = vpack.c.bf16 %v207_v63, %v206_v62 }
  0xf7   :  { %v174_v5 = vadd.f32 %v173_v2, %v93_v47  ;;  %v510_v6 = vpop.f32.mrb[6].mxu0 }
  0xf8   :  { %v204_v7 = vmul.f32 %v197_v44, %v182_v1  ;;  %v185_v8 = vadd.f32 %v510_v6, %v108_v4  ;;  %v176_v9 = vpop.f32.mrb[7].mxu0  ;;  %511 = vmatprep.subr.bf16.mxu1 %v234_v3  ;;  %vm195_vm6 = vcmp.ge.f32.partialorder %v182_v1, 0.0 }
  0xf9   :  { %v202_v10 = vmul.f32 %v197_v44, %v174_v5  ;;  %v177_v11 = vadd.f32 %v176_v9, %v98_v53  ;;  %512 = vmatpush3.bf16.msra.mxu1 %v234_v3  ;;  %vm193_vm7 = vcmp.ge.f32.partialorder %v174_v5, 0.0 }
  0xfa   :  { %vm196_vm8 = vcmp.ge.f32.partialorder %v185_v8, 0.0  ;;  %v205_v12 = vmul.f32 %v197_v44, %v185_v8  ;;  %513 = vmatprep.subr.bf16.mxu1 %v235_v0  ;;  %v212_v14 = vsel %vm195_vm6, %v182_v1, %v204_v7 }
  0xfb   :  { %vm194_vm9 = vcmp.ge.f32.partialorder %v177_v11, 0.0  ;;  %v203_v13 = vmul.f32 %v197_v44, %v177_v11  ;;  %v210_v16 = vsel %vm193_vm7, %v174_v5, %v202_v10  ;;  %v266_v44 = vpop.permute.xlu1 %265 }
  0xfc   :  { %v213_v15 = vsel %vm196_vm8, %v185_v8, %v205_v12 }
  0xfd   :  { %514 = vmatpush3.bf16.msra.mxu1 %v235_v0  ;;  %v211_v17 = vsel %vm194_vm9, %v177_v11, %v203_v13  ;;  %v237_v18 = vpack.c.bf16 %v213_v15, %v212_v14  ;;  %v382_v11 = vld [vmem:[%s787_s6] sm:$0xff]  ;;  %v392_v13 = vpop.permute.xlu0 %391  ;;  %s592_s6 = smov [#allocation5]  }
  0xfe   :  { %v236_v19 = vpack.c.bf16 %v211_v17, %v210_v16  ;;  %v383_v12 = vpack.c.bf16 %v382_v11, %v382_v11  ;;  %s461_s9 = sshll.u32 %s592_s6, 4  ;;  %s462_s9 = int_to_ptr.vmem [resolvable:$true] %s461_s9 }
  0xff   :  { %v276_v59 = vpop.permute.xlu1 %275  ;;  %s562_s10 = scalar_lea.vmem %s462_s9, 128  ;;  %p567_p6 = scmp.lt.s32.totalorder %s462_s9, %s462_s9 }
 0x100   :  { %515 = vmatprep.subr.bf16.mxu1 %v236_v19  ;;  %p563_p5 = scmp.ne.s32.totalorder %s462_s9, %s562_s10  ;;  %p568_p7 = scmp.lt.s32.totalorder %s562_s10, %s562_s10 }
 0x101   :  { %516 = vmatpush3.bf16.msra.mxu1 %v236_v19 }
 0x102   :  { %517 = vmatprep.subr.bf16.mxu1 %v237_v18  ;;  %p569_p8 = por %p568_p7, %p567_p6 }
 0x104   :  { %p570_p9 = pnand %p569_p8, %p563_p5 }
 0x105   :  { %518 = vmatpush3.bf16.msra.mxu1 %v237_v18 }
 0x108   :  { %520 = vmatmul.mubr.msk.bf16.vlgmr.msra.gmra.mrb[0].mxu1 %vm278_vm1, %v223_v24 }
 0x109   :  { %523 = vmatprep.mubr.msk.bf16.mxu1 %vm278_vm1, %v224_v25 }
 0x110   :  { %524 = vmatmul.mubr.msk.bf16.gmra.mrb[4].mxu1 %vm278_vm1, %v225_v28 }
 0x1db   :  { %v521_v34 = vpop.f32.mrb[0].mxu1 }
 0x1dc   :  { %v334_v36 = vadd.f32 %v521_v34, %v251_v32  ;;  %v325_v37 = vpop.f32.mrb[1].mxu1 }
 0x1dd   :  { %v326_v39 = vadd.f32 %v325_v37, %v241_v30  ;;  %v522_v40 = vpop.f32.mrb[2].mxu1 }
 0x1de   :  { %v368_v41 = vmul.f32 %v365_v35, %v334_v36  ;;  %v337_v42 = vadd.f32 %v522_v40, %v256_v33  ;;  %v328_v43 = vpop.f32.mrb[3].mxu1  ;;  %vm359_vm11 = vcmp.ge.f32.partialorder %v334_v36, 0.0 }
 0x1df   :  { %v366_v45 = vmul.f32 %v365_v35, %v326_v39  ;;  %v329_v46 = vadd.f32 %v328_v43, %v246_v31  ;;  %vm357_vm12 = vcmp.ge.f32.partialorder %v326_v39, 0.0 }
 0x1e0   :  { %vm360_vm13 = vcmp.ge.f32.partialorder %v337_v42, 0.0  ;;  %v369_v47 = vmul.f32 %v365_v35, %v337_v42  ;;  %v376_v49 = vsel %vm359_vm11, %v334_v36, %v368_v41 }
 0x1e1   :  { %vm358_vm14 = vcmp.ge.f32.partialorder %v329_v46, 0.0  ;;  %v367_v48 = vmul.f32 %v365_v35, %v329_v46  ;;  %v374_v52 = vsel %vm357_vm12, %v326_v39, %v366_v45 }
 0x1e2   :  { %v377_v50 = vsel %vm360_vm13, %v337_v42, %v369_v47 }
 0x1e3   :  { %v386_v53 = vpack.c.bf16 %v377_v50, %v376_v49  ;;  %v375_v54 = vsel %vm358_vm14, %v329_v46, %v367_v48  ;;  %v525_v55 = vpop.f32.mrb[4].mxu1 }
 0x1e4   :  { %v385_v56 = vpack.c.bf16 %v375_v54, %v374_v52  ;;  %v350_v57 = vadd.f32 %v525_v55, %v271_v51  ;;  %v341_v58 = vpop.f32.mrb[5].mxu1 }
 0x1e5   :  { %v342_v60 = vadd.f32 %v341_v58, %v261_v38  ;;  %v526_v61 = vpop.f32.mrb[6].mxu1 }
 0x1e6   :  { %v372_v62 = vmul.f32 %v365_v35, %v350_v57  ;;  %v353_v63 = vadd.f32 %v526_v61, %v276_v59  ;;  %v344_v0 = vpop.f32.mrb[7].mxu1  ;;  %528 = vmatpush3.bf16.msra.mxu0 %v385_v56  ;;  %vm363_vm15 = vcmp.ge.f32.partialorder %v350_v57, 0.0 }
 0x1e7   :  { %v370_v1 = vmul.f32 %v365_v35, %v342_v60  ;;  %v345_v2 = vadd.f32 %v344_v0, %v266_v44  ;;  %529 = vmatprep.subr.bf16.mxu0 %v590_v29  ;;  %vm361_vm0 = vcmp.ge.f32.partialorder %v342_v60, 0.0 }
 0x1e8   :  { %vm364_vm2 = vcmp.ge.f32.partialorder %v353_v63, 0.0  ;;  %v373_v3 = vmul.f32 %v365_v35, %v353_v63  ;;  %v380_v5 = vsel %vm363_vm15, %v350_v57, %v372_v62 }
 0x1e9   :  { %vm362_vm3 = vcmp.ge.f32.partialorder %v345_v2, 0.0  ;;  %v371_v4 = vmul.f32 %v365_v35, %v345_v2  ;;  %v378_v7 = vsel %vm361_vm0, %v342_v60, %v370_v1 }
 0x1ea   :  { %v381_v6 = vsel %vm364_vm2, %v353_v63, %v373_v3  ;;  %530 = vmatpush3.bf16.msra.mxu0 %v386_v53 }
 0x1eb   :  { %v388_v8 = vpack.c.bf16 %v381_v6, %v380_v5  ;;  %v379_v9 = vsel %vm362_vm3, %v345_v2, %v371_v4  ;;  %531 = vmatprep.subr.bf16.mxu0 %v590_v29 }
 0x1ec   :  { %v387_v10 = vpack.c.bf16 %v379_v9, %v378_v7 }
 0x1ee   :  { %532 = vmatpush3.bf16.msra.mxu0 %v387_v10 }
 0x1ef   :  { %533 = vmatprep.subr.bf16.mxu0 %v590_v29 }
 0x1f2   :  { %534 = vmatpush3.bf16.msra.mxu0 %v388_v8 }
 0x1f5   :  { %536 = vmatmul.mubr.msk.bf16.vlgmr.msra.gmra.mrb[8].mxu0 %vm278_vm1, %v383_v12 }
 0x2c8   :  { %v431_v14 = vpop.f32.mrb[8].mxu0 }
 0x2c9   :  { %v432_v15 = vadd.f32 %v431_v14, %v392_v13  ;;  %v537_v16 = vpop.f32.mrb[9].mxu0 }
 0x2ca   :  { %v434_v17 = vpop.f32.mrb[10].mxu0 }
 0x2cb   :  { %v437_v18 = vrot.slane %v432_v15, 4  ;;  %v538_v19 = vpop.f32.mrb[11].mxu0 }
 0x2cd   :  { %v438_v20 = vmax.f32 %v432_v15, %v437_v18 }
 0x2cf   :  { %v439_v21 = vrot.slane %v438_v20, 2 }
 0x2d1   :  { %v440_v22 = vmax.f32 %v438_v20, %v439_v21 }
 0x2d3   :  { %v441_v23 = vrot.slane %v440_v22, 1 }
 0x2d5   :  { %v442_v24 = vmax.f32 %v440_v22, %v441_v23 }
 0x2d7   :  { %v443_v25 = vsub.f32 %v432_v15, %v442_v24 }
 0x2d9   :  { %v444_v26 = vmul.f32 1.442695, %v443_v25 }
 0x2db   :  { %546 = vpow2.f32 %v444_v26 }
 0x2e5   :  { %v547_v27 = vpop.eup %546 }
 0x2e6   :  { %v446_v28 = vrot.slane %v547_v27, 4 }
 0x2e8   :  { %v447_v29 = vadd.f32 %v547_v27, %v446_v28 }
 0x2ea   :  { %v448_v30 = vrot.slane %v447_v29, 2 }
 0x2ec   :  { %v449_v31 = vadd.f32 %v448_v30, %v447_v29 }
 0x2ee   :  { %v450_v32 = vrot.slane %v449_v31, 1 }
 0x2f0   :  { %v451_v33 = vadd.f32 %v450_v32, %v449_v31 }
 0x2f2   :  { %548 = vrcp.f32 %v451_v33 }
 0x2fc   :  { %v549_v34 = vpop.eup %548 }
 0x2fd   :  { %v453_v35 = vmul.f32 %v549_v34, %v547_v27 }
 0x2ff   :  { %454 = vst [vmem:[#allocation5] sm:$0xff] %v453_v35 }
 0x300   :  { %573 = shalt.err (!%p570_p9)
}
 0x301   :  { %s574_s13 = scalar_lea.hbm %s789_s8, 128 }
 0x302   :  { %p575_p10 = scmp.ne.s32.totalorder %s789_s8, %s574_s13  ;;  %p578_p11 = scmp.lt.u32.totalorder %s574_s13, %s789_s8 }
 0x304   :  { %p580_p12 = pnand %p578_p11, %p575_p10 }
 0x306   :  { %583 = shalt.err (!%p580_p12)
}
 0x307   :  { %464 = dma.vmem_to_hbm [thread:$0]  %s462_s9, 128, %s789_s8, [#allocation3]  }
 0x308   :  { %586 = dma.done.wait [#allocation3], 128  }
 0x309   :  { %587 = vsyncadd [#allocation3], 4294967168 }
 0x30a   :  { %468 = vsyncpa [#allocation3], 1 }
 0x30b   :  { %469 = vsyncpa [#allocation4], 1 }

</bundles_post_ra>
